<compile_context>
chip_gen: v5e
topology: v5e:2x2
jax: 0.10.0
libtpu: 0.0.40
codegen_flags: <defaults>
</compile_context>

<pallas_src>
import functools

import jax
import jax.numpy as jnp
from jax.experimental import pallas as pl
from jax.experimental.pallas import tpu as pltpu


# ----------------------- kernel 1: fused projection matmul -----------------------

def _proj_kernel(x_ref, w_ref, b_ref, o_ref):
    o_ref[...] = (
        jnp.dot(x_ref[...], w_ref[...], preferred_element_type=jnp.float32)
        + b_ref[...]
    ).astype(o_ref.dtype)


def _project(x, w_cat, b_cat, tile_m):
    n, cin = x.shape
    c2 = w_cat.shape[1]
    grid = (pl.cdiv(n, tile_m),)
    return pl.pallas_call(
        _proj_kernel,
        out_shape=jax.ShapeDtypeStruct((n, c2), jnp.float32),
        grid=grid,
        in_specs=[
            pl.BlockSpec((tile_m, cin), lambda i: (i, 0)),
            pl.BlockSpec((cin, c2), lambda i: (0, 0)),
            pl.BlockSpec((1, c2), lambda i: (0, 0)),
        ],
        out_specs=pl.BlockSpec((tile_m, c2), lambda i: (i, 0)),
        compiler_params=pltpu.CompilerParams(dimension_semantics=("parallel",)),
        cost_estimate=pl.CostEstimate(
            flops=2 * n * cin * c2,
            transcendentals=0,
            bytes_accessed=4 * (n * cin + cin * c2 + c2 + n * c2),
        ),
    )(x, w_cat, b_cat)


# --------------------- kernel 2: tiled segment-max + combine ---------------------

def _segmax_kernel(klo_ref, khi_ref,            # scalar-prefetch (SMEM)
                   col_ref, rel_ref, yphi_ref, bt_ref,   # VMEM inputs
                   out_ref, acc_ref,             # output + scratch
                   *, tile_n):
    i = pl.program_id(0)          # node tile
    k = pl.program_id(1)          # edge tile (reduction axis, last in grid)

    @pl.when(k == 0)
    def _init():
        acc_ref[...] = jnp.full_like(acc_ref, -jnp.inf)

    lo = klo_ref[i]
    hi = khi_ref[i]

    # Only edge tiles that can contain edges destined to this node tile do any work
    # (their DMAs are also clamped away in the index_map).
    @pl.when(jnp.logical_and(k >= lo, k <= hi))
    def _accumulate():
        col = col_ref[...]                         # [TE, 1] int32 (sorted; -1 padding)
        rel = rel_ref[...]                         # [TE, C]  lane-dense in Cout
        base = i * tile_n
        rows = []
        for n in range(tile_n):                    # small static unroll (tile_n = 8)
            m = col == (base + n)                  # [TE, 1]
            v = jnp.where(m, rel, -jnp.inf)        # [TE, C]
            rows.append(jnp.max(v, axis=0, keepdims=True))   # sublane reduce -> [1, C]
        tile_max = jnp.concatenate(rows, axis=0)   # [TN, C]
        acc_ref[...] = jnp.maximum(acc_ref[...], tile_max)

    @pl.when(k == pl.num_programs(1) - 1)
    def _finalize():
        m = acc_ref[...]
        # theta bias added only to non-empty segments; empty nodes -> 0 (torch_scatter).
        aggr = jnp.where(jnp.isneginf(m), 0.0, m + bt_ref[...])
        out_ref[...] = (aggr + yphi_ref[...]).astype(out_ref.dtype)


# ------------------------------------ wrapper ------------------------------------

def devconv_forward(x, edge_index, w_theta, b_theta, w_phi, b_phi,
                    *, tile_n=8, tile_e=128, tile_m=256):
    """x: [N, Cin] f32; edge_index: [2, E] int32; weights stored transposed [Cin, Cout]."""
    n, cin = x.shape
    cout = w_theta.shape[1]
    row = edge_index[0].astype(jnp.int32)
    col = edge_index[1].astype(jnp.int32)
    e = int(row.shape[0])

    # --- fused projection: one matmul for both linear layers (theta half without bias) ---
    w_cat = jnp.concatenate([w_phi, w_theta], axis=1)                       # [Cin, 2C]
    b_cat = jnp.concatenate([b_phi, jnp.zeros_like(b_theta)]).reshape(1, -1)
    tile_m = min(tile_m, n)
    proj = _project(x, w_cat, b_cat, tile_m)                                # [N, 2C]
    y_phi = proj[:, :cout]                                                  # W_phi(x) + b_phi
    y_theta = proj[:, cout:]                                                # x @ W_theta (no bias)

    # --- glue: sort edges by destination, gather projected features (XLA) ---
    perm = jnp.argsort(col)
    col_s = col[perm]
    row_s = row[perm]
    # rel[e] = W_theta(x[row] - x[col]) (bias-free) = y_theta[row] - y_theta[col]
    rel = jnp.take(y_theta, row_s, axis=0) - jnp.take(y_theta, col_s, axis=0)  # [E, C]

    # pad the edge axis to a multiple of tile_e; -1 sentinel never matches a node id
    num_e_tiles = pl.cdiv(e, tile_e)
    e_pad = num_e_tiles * tile_e
    pad = e_pad - e
    col_p = jnp.pad(col_s, (0, pad), constant_values=-1).reshape(e_pad, 1)
    rel_p = jnp.pad(rel, ((0, pad), (0, 0)))

    # per node tile: contiguous (because sorted) range of edge tiles holding its edges
    num_n_tiles = pl.cdiv(n, tile_n)
    tile_starts = jnp.arange(num_n_tiles, dtype=jnp.int32) * tile_n
    seg_lo = jnp.searchsorted(col_s, tile_starts, side="left")
    seg_hi = jnp.searchsorted(col_s, tile_starts + tile_n, side="left")
    has_e = seg_hi > seg_lo
    k_lo = jnp.where(has_e, seg_lo // tile_e, 0).astype(jnp.int32)
    k_hi = jnp.where(has_e, (seg_hi - 1) // tile_e, -1).astype(jnp.int32)

    # data-dependent (clamped) edge-tile index map: out-of-range k re-uses an
    # already-fetched block, so Pallas skips the DMA for skipped iterations.
    def edge_map(i, k, klo, khi):
        lo = klo[i]
        hi = jnp.maximum(khi[i], lo)
        kk = jnp.minimum(jnp.maximum(k, lo), hi)
        return (kk, 0)

    def node_map(i, k, klo, khi):
        return (i, 0)

    def const_map(i, k, klo, khi):
        return (0, 0)

    grid_spec = pltpu.PrefetchScalarGridSpec(
        num_scalar_prefetch=2,
        grid=(num_n_tiles, num_e_tiles),        # reduction (edge) axis last
        in_specs=[
            pl.BlockSpec((tile_e, 1), edge_map),        # sorted destinations
            pl.BlockSpec((tile_e, cout), edge_map),     # projected edge features
            pl.BlockSpec((tile_n, cout), node_map),     # W_phi(x) + b_phi
            pl.BlockSpec((1, cout), const_map),         # b_theta (added post-max)
        ],
        out_specs=pl.BlockSpec((tile_n, cout), node_map),
        scratch_shapes=[pltpu.VMEM((tile_n, cout), jnp.float32)],
    )

    kernel = functools.partial(_segmax_kernel, tile_n=tile_n)
    return pl.pallas_call(
        kernel,
        out_shape=jax.ShapeDtypeStruct((n, cout), jnp.float32),
        grid_spec=grid_spec,
        compiler_params=pltpu.CompilerParams(
            dimension_semantics=("parallel", "arbitrary")),
        cost_estimate=pl.CostEstimate(
            flops=4 * e_pad * tile_n * cout,
            transcendentals=0,
            bytes_accessed=4 * (e_pad * (cout + 1) + 3 * n * cout),
        ),
    )(k_lo, k_hi, col_p, rel_p, y_phi, b_theta.reshape(1, -1))


if __name__ == "__main__":
    key = jax.random.PRNGKey(0)
    N, E, Cin, Cout = 64, 256, 16, 32
    k = jax.random.split(key, 7)

    x = jax.random.normal(k[0], (N, Cin), jnp.float32)
    row = jax.random.randint(k[1], (E,), 0, N, dtype=jnp.int32)
    col = jax.random.randint(k[2], (E,), 0, N, dtype=jnp.int32)
    edge_index = jnp.stack([row, col])

    # Deterministic nn.Linear-style init (uniform +-1/sqrt(fan_in)), weights transposed.
    lim = 1.0 / (Cin ** 0.5)
    w_theta = jax.random.uniform(k[3], (Cin, Cout), jnp.float32, -lim, lim)
    b_theta = jax.random.uniform(k[4], (Cout,), jnp.float32, -lim, lim)
    w_phi = jax.random.uniform(k[5], (Cin, Cout), jnp.float32, -lim, lim)
    b_phi = jax.random.uniform(k[6], (Cout,), jnp.float32, -lim, lim)

    out = devconv_forward(x, edge_index, w_theta, b_theta, w_phi, b_phi)
    out = jax.block_until_ready(out)

    # Pure-JAX reference (original association: gather raw features, then project).
    rel_ref = x[row] - x[col]
    rel_t = rel_ref @ w_theta + b_theta
    x_t = x @ w_phi + b_phi
    aggr = jax.ops.segment_max(rel_t, col, num_segments=N)
    aggr = jnp.where(jnp.isneginf(aggr), 0.0, aggr)
    ref = x_t + aggr

    # project-then-gather reassociates the float32 matmuls -> allow rounding-level slack.
    assert jnp.allclose(out, ref, atol=1e-4, rtol=1e-5), \
        float(jnp.max(jnp.abs(out - ref)))
    print("KERNEL_OK")
</pallas_src>

<mosaic_0001>
module attributes {stable_mosaic.version = 11 : i64} {
  func.func @_proj_kernel(%arg0: i32, %arg1: memref<64x16xf32, #tpu.memory_space<vmem>>, %arg2: memref<16x64xf32, #tpu.memory_space<vmem>>, %arg3: memref<1x64xf32, #tpu.memory_space<vmem>>, %arg4: memref<64x64xf32, #tpu.memory_space<vmem>>) attributes {dimension_semantics = [#tpu.dimension_semantics<parallel>], iteration_bounds = array<i64: 1>, scalar_prefetch = 0 : i64, scratch_operands = 0 : i64, tpu.core_type = #tpu.core_type<tc>, window_params = [{transform_indices = @transform_0, window_bounds = array<i64: 64, 16>}, {pipeline_mode = #tpu.pipeline_mode<synchronous>, transform_indices = @transform_1, window_bounds = array<i64: 16, 64>}, {pipeline_mode = #tpu.pipeline_mode<synchronous>, transform_indices = @transform_2, window_bounds = array<i64: 1, 64>}, {transform_indices = @transform_3, window_bounds = array<i64: 64, 64>}]} {
    %c0 = arith.constant 0 : index
    %c0_0 = arith.constant 0 : index
    %0 = vector.load %arg1[%c0, %c0_0] : memref<64x16xf32, #tpu.memory_space<vmem>>, vector<64x16xf32>
    %c0_1 = arith.constant 0 : index
    %c0_2 = arith.constant 0 : index
    %1 = vector.load %arg2[%c0_1, %c0_2] : memref<16x64xf32, #tpu.memory_space<vmem>>, vector<16x64xf32>
    %cst = arith.constant dense<0.000000e+00> : vector<64x64xf32>
    %2 = tpu.matmul %0, %1, %cst {dimension_numbers = #tpu.dot_dimension_numbers<[1], [0], [0], [1], [0, 0, 1, 1], [], []>} : vector<64x16xf32>, vector<16x64xf32>, vector<64x64xf32> -> vector<64x64xf32>
    %c0_3 = arith.constant 0 : index
    %c0_4 = arith.constant 0 : index
    %3 = vector.load %arg3[%c0_3, %c0_4] : memref<1x64xf32, #tpu.memory_space<vmem>>, vector<1x64xf32>
    %4 = vector.broadcast %3 : vector<1x64xf32> to vector<64x64xf32>
    %5 = arith.addf %2, %4 : vector<64x64xf32>
    %c0_5 = arith.constant 0 : index
    %c0_6 = arith.constant 0 : index
    %6 = vector.load %arg4[%c0_5, %c0_6] : memref<64x64xf32, #tpu.memory_space<vmem>>, vector<64x64xf32>
    tpu.vector_store %arg4[%c0_5, %c0_6], %5 {strides = array<i32>} : memref<64x64xf32, #tpu.memory_space<vmem>>, vector<64x64xf32>,
    return
  }
  func.func @transform_0(%arg0: i32) -> (i32, i32) {
    %c0_i32 = arith.constant 0 : i32
    %c0_i32_0 = arith.constant 0 : i32
    return %arg0, %c0_i32 : i32, i32
  }
  func.func @transform_1(%arg0: i32) -> (i32, i32) {
    %c0_i32 = arith.constant 0 : i32
    %c0_i32_0 = arith.constant 0 : i32
    %c0_i32_1 = arith.constant 0 : i32
    return %c0_i32, %c0_i32_0 : i32, i32
  }
  func.func @transform_2(%arg0: i32) -> (i32, i32) {
    %c0_i32 = arith.constant 0 : i32
    %c0_i32_0 = arith.constant 0 : i32
    %c0_i32_1 = arith.constant 0 : i32
    return %c0_i32, %c0_i32_0 : i32, i32
  }
  func.func @transform_3(%arg0: i32) -> (i32, i32) {
    %c0_i32 = arith.constant 0 : i32
    %c0_i32_0 = arith.constant 0 : i32
    return %arg0, %c0_i32 : i32, i32
  }
}

</mosaic_0001>

<bundles_post_ra>
// kernel: tpu_custom_call.1
= control target key start
LH: loop header
LB: loop body
LE: loop exit
PB: predicated region body
PF: predicated region fallthrough
CT: control target
= control target key end

     0   :  { %vm29_vm0 = vcmask 130048   ;;  %s241_s0 = inlined_call_operand.vmem [shape: f32[64,16], index: 0, kind: input, shape index: {}]   ;;  %s242_s1 = inlined_call_operand.vmem [shape: f32[16,64], index: 1, kind: input, shape index: {}]   ;;  %s243_s2 = inlined_call_operand.vmem [shape: f32[1,64], index: 2, kind: input, shape index: {}]   ;;  %s244_s3 = inlined_call_operand.hbm [shape: f32[64,64], index: 3, kind: output, shape index: {}]  }
   0x1   :  { %v24_v0 = vld [vmem:[%s242_s1 + $0x8] sm:$0xff]  ;;  %v23_v1 = vld [vmem:[%s242_s1] sm:$0xff]  ;;  %v21_v3 = vld [vmem:[%s241_s0 + $0x30] sm:$0xff] }
   0x2   :  { %131 = vmatpush.msra.mxu2 %v24_v0  ;;  %132 = vmatpush.msra.mxu3 %v24_v0  ;;  %v19_v2 = vld [vmem:[%s241_s0 + $0x20] sm:$0xff]  ;;  %v17_v5 = vld [vmem:[%s241_s0 + $0x10] sm:$0xff] }
   0x3   :  { %68 = vmatpush.msra.mxu0 %v24_v0  ;;  %130 = vmatpush.msra.mxu1 %v24_v0  ;;  %v15_v4 = vld [vmem:[%s241_s0] sm:$0xff] }
   0x4   :  { %134 = vmatpush.msra.mxu2 %v23_v1  ;;  %135 = vmatpush.msra.mxu3 %v23_v1 }
   0x5   :  { %126 = vmatmul.msk.f32.vlgmr.msra.gmra.mxu2 %vm29_vm0, %v19_v2  ;;  %128 = vmatmul.msk.f32.vlgmr.msra.gmra.mxu3 %vm29_vm0, %v21_v3 }
   0x6   :  { %8 = vsyncpa [#allocation3], 0  ;;  %69 = vmatpush.msra.mxu0 %v23_v1  ;;  %133 = vmatpush.msra.mxu1 %v23_v1  ;;  %v20_v6 = vld [vmem:[%s241_s0 + $0x28] sm:$0xff]  ;;  %v22_v7 = vld [vmem:[%s241_s0 + $0x38] sm:$0xff]  ;;  %vm95_vm1 = vcmask 523264   ;;  %s110_s8 = sshll.u32 %s244_s3, 4  ;;  %s111_s8 = int_to_ptr.hbm [resolvable:$true] %s110_s8 }
   0x7   :  { %122 = vmatmul.msk.f32.vlgmr.msra.gmra.mxu0 %vm29_vm0, %v15_v4  ;;  %124 = vmatmul.msk.f32.vlgmr.msra.gmra.mxu1 %vm29_vm0, %v17_v5  ;;  %v16_v8 = vld [vmem:[%s241_s0 + $0x8] sm:$0xff]  ;;  %v18_v9 = vld [vmem:[%s241_s0 + $0x18] sm:$0xff]  ;;  %v139_v10 = vld [vmem:[%s243_s2] ss:$0 sm:$0xff]  ;;  %s166_s0 = smov [#allocation2]   ;;  %s167_s9 = smov 128  }
   0x8   :  { %s108_s2 = sshll.u32 %s166_s0, 4  ;;  %s168_s10 = smov 8   ;;  %s109_s2 = int_to_ptr.vmem [resolvable:$true] %s108_s2 }
   0xd   :  { %127 = vmatmul.msk.f32.gmra.mxu2 %vm29_vm0, %v20_v6  ;;  %129 = vmatmul.msk.f32.gmra.mxu3 %vm29_vm0, %v22_v7 }
   0xf   :  { %123 = vmatmul.msk.f32.gmra.mxu0 %vm29_vm0, %v16_v8  ;;  %125 = vmatmul.msk.f32.gmra.mxu1 %vm29_vm0, %v18_v9 }
  0x84   :  { %v71_v11 = vpop.f32.mrf.mxu0  ;;  %v77_v12 = vpop.f32.mrf.mxu1 }
  0x85   :  { %v72_v13 = vadd.f32 %v139_v10, %v71_v11  ;;  %v78_v14 = vadd.f32 %v139_v10, %v77_v12 }
  0x87   :  { %96 = vst.msk [vmem:[#allocation2] sm:$0xff] %vm95_vm1, %v72_v13 }
  0x88   :  { %98 = vst.msk [vmem:[#allocation2 + $0x10] sm:$0xff] %vm95_vm1, %v78_v14  ;;  %v83_v15 = vpop.f32.mrf.mxu2  ;;  %v89_v16 = vpop.f32.mrf.mxu3 }
  0x89   :  { %v84_v17 = vadd.f32 %v139_v10, %v83_v15  ;;  %v90_v18 = vadd.f32 %v139_v10, %v89_v16 }
  0x8b   :  { %100 = vst.msk [vmem:[#allocation2 + $0x20] sm:$0xff] %vm95_vm1, %v84_v17 }
  0x8c   :  { %102 = vst.msk [vmem:[#allocation2 + $0x30] sm:$0xff] %vm95_vm1, %v90_v18  ;;  %v74_v19 = vpop.f32.mrf.mxu0  ;;  %v80_v20 = vpop.f32.mrf.mxu1 }
  0x8d   :  { %v75_v21 = vadd.f32 %v139_v10, %v74_v19  ;;  %v81_v22 = vadd.f32 %v139_v10, %v80_v20 }
  0x8f   :  { %97 = vst.msk [vmem:[#allocation2 + $0x8] sm:$0xff] %vm95_vm1, %v75_v21 }
  0x90   :  { %99 = vst.msk [vmem:[#allocation2 + $0x18] sm:$0xff] %vm95_vm1, %v81_v22  ;;  %v86_v23 = vpop.f32.mrf.mxu2  ;;  %v92_v24 = vpop.f32.mrf.mxu3 }
  0x91   :  { %v87_v25 = vadd.f32 %v139_v10, %v86_v23  ;;  %v93_v26 = vadd.f32 %v139_v10, %v92_v24 }
  0x93   :  { %101 = vst.msk [vmem:[#allocation2 + $0x28] sm:$0xff] %vm95_vm1, %v87_v25 }
  0x94   :  { %103 = vst.msk [vmem:[#allocation2 + $0x38] sm:$0xff] %vm95_vm1, %v93_v26 }
  0x95   :  { %116 = dma.vmem_to_hbm [thread:$0]  %s109_s2, 1024, %s111_s8, [#allocation3], %s167_s9, %s167_s9, %s168_s10  }
  0x96   :  { %164 = dma.done.wait [#allocation3], 1024  }
  0x97   :  { %165 = vsyncadd [#allocation3], 4294966272 }
  0x98   :  { %121 = vsyncpa [#allocation3], 1 }

</bundles_post_ra>
